<compile_context>
chip_gen: v5e
topology: v5e:2x2
jax: 0.10.0
libtpu: 0.0.40
codegen_flags: <defaults>
</compile_context>

<pallas_src>
import jax
import jax.numpy as jnp
from jax.experimental import pallas as pl
from jax.experimental.pallas import tpu as pltpu
from functools import partial


def _localnorm_kernel(x_ref, xn_ref, ms_ref, *, eps, inv_cm1):
    # x_ref block: (bn, C, T). Upcast once to f32 (free: HBM-bandwidth bound).
    x = x_ref[...].astype(jnp.float32)

    mean = jnp.mean(x, axis=1, keepdims=True)                   # (bn,1,T) f32
    diff = x - mean                                             # (bn,C,T) f32
    # Bessel-corrected variance; /(C-1) folded into a compile-time multiply.
    var = jnp.sum(diff * diff, axis=1, keepdims=True) * inv_cm1
    std = jnp.sqrt(var)                                         # (bn,1,T) f32

    # Exact reciprocal/divide (the approx EUP reciprocal was not accurate
    # enough vs the reference); still only (bn,1,T) lanes of work.
    inv = jnp.float32(1.0) / (std + jnp.float32(eps))

    xn_ref[...] = (diff * inv).astype(xn_ref.dtype)
    # Two sub-slice stores instead of a sublane concat.
    ms_ref[:, 0:1, :] = mean.astype(ms_ref.dtype)
    ms_ref[:, 1:2, :] = std.astype(ms_ref.dtype)


def _plan(N, C, HW, dtype):
    """Pick (bn, t_hw, vmem_limit): batch rows per block, lane tile, VMEM cap."""
    itemsize = jnp.dtype(dtype).itemsize
    pack = 8 * max(1, 4 // itemsize)          # sublane rows per tile: 8/16/32
    c_pad = -(-C // pack) * pack              # sublane-padded C (native dtype)
    c_pad_f32 = -(-C // 8) * 8                # sublane-padded C (f32 temps)
    hw128 = -(-HW // 128) * 128

    # Generation-aware VMEM budgeting (v7x: 64 MiB/TC, v5e/v6e: 128 MiB).
    try:
        vmem_cap = int(pltpu.get_tpu_info().vmem_capacity_bytes)
    except Exception:
        vmem_cap = 64 * 1024 * 1024           # conservative fallback (v7x)
    vmem_limit = min((vmem_cap * 3) // 4, 64 * 1024 * 1024)
    budget = vmem_limit // 2                  # blocks + in-kernel temporaries

    # Bytes per lane column per batch row in a block (sublane-padded):
    per_lane = (2 * 2 * c_pad * itemsize      # input + xn output, double-buffered
                + 2 * pack * itemsize         # packed mean/std out, double-buffered
                + 2 * c_pad_f32 * 4           # f32 x / diff temporaries
                + 4 * 8 * 4)                  # f32 stat row vectors

    t = (budget // per_lane // 128) * 128
    t = max(128, min(t, hw128))

    bn = 1
    if t == hw128 and N > 1:
        # One HW block per row is small -> pack multiple batch rows per block.
        bn = int(max(1, min(N, budget // (per_lane * t))))

    # v7x megacore: make sure there are >= 2 grid steps when possible.
    steps = (-(-N // bn)) * (-(-HW // t))
    if steps < 2:
        if bn > 1:
            bn = -(-N // 2)
        elif hw128 > 128:
            t = max(128, ((hw128 // 2) // 128) * 128)
    return int(bn), int(t), int(vmem_limit)


def local_norm(x, eps=1e-5):
    """x: (N, C, H, W) -> (x_norm, mean, std) matching PyTorch LocalNorm."""
    N, C, H, W = x.shape
    HW = H * W
    bn, t_hw, vmem_limit = _plan(N, C, HW, x.dtype)

    x3 = x.reshape(N, C, HW)

    # Folding 1/(C-1) at trace time; C==1 -> NaN std, matching torch unbiased std.
    inv_cm1 = (1.0 / (C - 1)) if C > 1 else float("nan")
    kernel = partial(_localnorm_kernel, eps=float(eps), inv_cm1=inv_cm1)

    grid = (pl.cdiv(N, bn), pl.cdiv(HW, t_hw))

    xn, ms = pl.pallas_call(
        kernel,
        out_shape=(
            jax.ShapeDtypeStruct((N, C, HW), x.dtype),   # x_norm
            jax.ShapeDtypeStruct((N, 2, HW), x.dtype),   # packed [mean; std]
        ),
        grid_spec=pltpu.PrefetchScalarGridSpec(
            num_scalar_prefetch=0,
            grid=grid,
            in_specs=[pl.BlockSpec((bn, C, t_hw), lambda i, j: (i, 0, j))],
            out_specs=[
                pl.BlockSpec((bn, C, t_hw), lambda i, j: (i, 0, j)),
                pl.BlockSpec((bn, 2, t_hw), lambda i, j: (i, 0, j)),
            ],
        ),
        compiler_params=pltpu.CompilerParams(
            dimension_semantics=("parallel", "parallel"),
            vmem_limit_bytes=vmem_limit,
        ),
    )(x3)

    xn = xn.reshape(N, C, H, W)
    mean = ms[:, 0:1, :].reshape(N, 1, H, W)
    std = ms[:, 1:2, :].reshape(N, 1, H, W)
    return xn, mean, std


def _local_norm_ref(x, eps=1e-5):
    mean = jnp.mean(x, axis=1, keepdims=True)
    var = jnp.sum((x - mean) ** 2, axis=1, keepdims=True) / (x.shape[1] - 1)
    std = jnp.sqrt(var)
    return (x - mean) / (std + eps), mean, std


if __name__ == "__main__":
    key = jax.random.PRNGKey(0)
    x = jax.random.normal(key, (2, 4, 16, 16), dtype=jnp.float32)

    xn, mean, std = local_norm(x, eps=1e-5)
    jax.block_until_ready((xn, mean, std))

    xn_r, mean_r, std_r = _local_norm_ref(x, eps=1e-5)
    assert jnp.allclose(mean, mean_r, atol=1e-5, rtol=1e-5)
    assert jnp.allclose(std, std_r, atol=1e-5, rtol=1e-5)
    assert jnp.allclose(xn, xn_r, atol=1e-5, rtol=1e-5)

    print("KERNEL_OK")
</pallas_src>

<mosaic_0001>
module attributes {stable_mosaic.version = 11 : i64} {
  func.func @_localnorm_kernel(%arg0: i32, %arg1: i32, %arg2: memref<1x4x256xf32, #tpu.memory_space<vmem>>, %arg3: memref<1x4x256xf32, #tpu.memory_space<vmem>>, %arg4: memref<1x2x256xf32, #tpu.memory_space<vmem>>) attributes {dimension_semantics = [#tpu.dimension_semantics<parallel>, #tpu.dimension_semantics<parallel>], iteration_bounds = array<i64: 2, 1>, scalar_prefetch = 0 : i64, scratch_operands = 0 : i64, tpu.core_type = #tpu.core_type<tc>, window_params = [{transform_indices = @transform_0, window_bounds = array<i64: 1, 4, 256>}, {transform_indices = @transform_1, window_bounds = array<i64: 1, 4, 256>}, {transform_indices = @transform_2, window_bounds = array<i64: 1, 2, 256>}]} {
    %c0 = arith.constant 0 : index
    %c0_0 = arith.constant 0 : index
    %c0_1 = arith.constant 0 : index
    %0 = vector.load %arg2[%c0, %c0_0, %c0_1] : memref<1x4x256xf32, #tpu.memory_space<vmem>>, vector<1x4x256xf32>
    %cst = arith.constant dense<0.000000e+00> : vector<1x256xf32>
    %1 = vector.multi_reduction <add>, %0, %cst [1] : vector<1x4x256xf32> to vector<1x256xf32>
    %2 = vector.shape_cast %1 : vector<1x256xf32> to vector<1x1x256xf32>
    %cst_2 = arith.constant 4.000000e+00 : f32
    %3 = vector.broadcast %cst_2 : f32 to vector<1x1x256xf32>
    %4 = arith.divf %2, %3 : vector<1x1x256xf32>
    %5 = vector.broadcast %4 : vector<1x1x256xf32> to vector<1x4x256xf32>
    %6 = arith.subf %0, %5 : vector<1x4x256xf32>
    %7 = arith.mulf %6, %6 : vector<1x4x256xf32>
    %cst_3 = arith.constant dense<0.000000e+00> : vector<1x256xf32>
    %8 = vector.multi_reduction <add>, %7, %cst_3 [1] : vector<1x4x256xf32> to vector<1x256xf32>
    %9 = vector.shape_cast %8 : vector<1x256xf32> to vector<1x1x256xf32>
    %cst_4 = arith.constant 0.333333343 : f32
    %10 = vector.broadcast %cst_4 : f32 to vector<1x1x256xf32>
    %11 = arith.mulf %9, %10 : vector<1x1x256xf32>
    %12 = math.sqrt %11 : vector<1x1x256xf32>
    %cst_5 = arith.constant 9.99999974E-6 : f32
    %13 = vector.broadcast %cst_5 : f32 to vector<1x1x256xf32>
    %14 = arith.addf %12, %13 : vector<1x1x256xf32>
    %cst_6 = arith.constant 1.000000e+00 : f32
    %15 = vector.broadcast %cst_6 : f32 to vector<1x1x256xf32>
    %16 = arith.divf %15, %14 : vector<1x1x256xf32>
    %17 = vector.broadcast %16 : vector<1x1x256xf32> to vector<1x4x256xf32>
    %18 = arith.mulf %6, %17 : vector<1x4x256xf32>
    %c0_7 = arith.constant 0 : index
    %c0_8 = arith.constant 0 : index
    %c0_9 = arith.constant 0 : index
    %19 = vector.load %arg3[%c0_7, %c0_8, %c0_9] : memref<1x4x256xf32, #tpu.memory_space<vmem>>, vector<1x4x256xf32>
    tpu.vector_store %arg3[%c0_7, %c0_8, %c0_9], %18 {strides = array<i32>} : memref<1x4x256xf32, #tpu.memory_space<vmem>>, vector<1x4x256xf32>,
    %c0_10 = arith.constant 0 : index
    %c0_11 = arith.constant 0 : index
    %c0_12 = arith.constant 0 : index
    %20 = vector.load %arg4[%c0_10, %c0_11, %c0_12] : memref<1x2x256xf32, #tpu.memory_space<vmem>>, vector<1x1x256xf32>
    tpu.vector_store %arg4[%c0_10, %c0_11, %c0_12], %4 {strides = array<i32>} : memref<1x2x256xf32, #tpu.memory_space<vmem>>, vector<1x1x256xf32>,
    %c0_13 = arith.constant 0 : index
    %c1 = arith.constant 1 : index
    %c0_14 = arith.constant 0 : index
    %21 = vector.load %arg4[%c0_13, %c1, %c0_14] : memref<1x2x256xf32, #tpu.memory_space<vmem>>, vector<1x1x256xf32>
    tpu.vector_store %arg4[%c0_13, %c1, %c0_14], %12 {strides = array<i32>} : memref<1x2x256xf32, #tpu.memory_space<vmem>>, vector<1x1x256xf32>,
    return
  }
  func.func @transform_0(%arg0: i32, %arg1: i32) -> (i32, i32, i32) {
    %c0_i32 = arith.constant 0 : i32
    %c0_i32_0 = arith.constant 0 : i32
    return %arg0, %c0_i32, %arg1 : i32, i32, i32
  }
  func.func @transform_1(%arg0: i32, %arg1: i32) -> (i32, i32, i32) {
    %c0_i32 = arith.constant 0 : i32
    %c0_i32_0 = arith.constant 0 : i32
    return %arg0, %c0_i32, %arg1 : i32, i32, i32
  }
  func.func @transform_2(%arg0: i32, %arg1: i32) -> (i32, i32, i32) {
    %c0_i32 = arith.constant 0 : i32
    %c0_i32_0 = arith.constant 0 : i32
    return %arg0, %c0_i32, %arg1 : i32, i32, i32
  }
}

</mosaic_0001>

<bundles_post_ra>
// kernel: tpu_custom_call.1
= control target key start
LH: loop header
LB: loop body
LE: loop exit
PB: predicated region body
PF: predicated region fallthrough
CT: control target
= control target key end

     0   :  { %8 = vsyncpa [#allocation3], 0  ;;  %s931_s0 = inlined_call_operand.hbm [shape: f32[2,4,256], index: 0, kind: input, shape index: {}]   ;;  %s932_s1 = inlined_call_operand.hbm [shape: f32[2,4,256], index: 1, kind: output, shape index: {0}]   ;;  %s933_s2 = inlined_call_operand.hbm [shape: f32[2,2,256], index: 2, kind: output, shape index: {1}]  }
   0x1   :  { %10 = vsyncpa [#allocation3 + $0x1], 0 }
   0x2   :  { %11 = vsyncpa [#allocation4], 0 }
   0x3   :  { %13 = vsyncpa [#allocation4 + $0x1], 0 }
   0x4   :  { %14 = vsyncpa [#allocation7], 0 }
   0x5   :  { %16 = vsyncpa [#allocation7 + $0x1], 0  ;;  %s759_s9 = smov 0   ;;  %s761_s10 = smov 0  }
   0x6   :  { %s763_s11 = smov 0   ;;  %s765_s12 = smov 0  }
   0x7   :  { %s767_s13 = smov 0   ;;  %s769_s14 = smov 0  }
   0x8 LB: > { %s496_s15 = sadd.s32 4294967295, %s741_s14   ;;  %s497_s16 = sadd.s32 4294967294, %s741_s14   ;;  %s741_s14 = sphi %s769_s14, %s22_s14   ;;  %s737_s13 = sphi %s767_s13, %s946_s13   ;;  %s733_s12 = sphi %s765_s12, %s945_s12   ;;  %s729_s11 = sphi %s763_s11, %s944_s11   ;;  %s725_s10 = sphi %s761_s10, %s943_s10   ;;  %s721_s9 = sphi %s759_s9, %s942_s9  }
   0x9   : > { %s34_s17 = sadd.s32 1, %s737_s13  ;;  %s43_s18 = sadd.s32 1, %s729_s11 }
   0xa   : > { %p36_p0 = scmp.ge.s32.totalorder %s34_s17, 2  ;;  %p50_p1 = scmp.ne.s32.totalorder %s729_s11, %s725_s10 }
   0xb   : > { %p51_p2 = scmp.eq.s32.totalorder %s741_s14, 0  ;;  %p56_p3 = scmp.ne.s32.totalorder %s725_s10, %s721_s9 }
   0xc   : > { %s948_s17 = smov (%p36_p0, %s34_s17), 0  ;;  %p57_p5 = scmp.eq.s32.totalorder %s496_s15, 0 }
   0xd   : > { %p800_p4 = por %p51_p2, %p50_p1  ;;  %s38_s20 = ssub.s32 %s737_s13, %s948_s17 }
   0xe   : > { %p82_p6 = scmp.eq.s32.totalorder %s496_s15, 1  ;;  %p41_p7 = scmp.eq.s32.totalorder %s38_s20, 0 }
   0xf   : > { %p806_p8 = por %p57_p5, %p56_p3  ;;  %p88_p10 = scmp.eq.s32.totalorder %s497_s16, 1 }
  0x10   : > { %p810_p9 = por %p82_p6, %p50_p1  ;;  %p499_p12 = scmp.ge.s32.totalorder %s741_s14, 2 }
  0x11   : > { %s815_s23 = scalar_select %p41_p7, %s729_s11, %s43_s18  }
  0x12   : > { %p817_p11 = por %p88_p10, %p56_p3  ;;  %p536_p13 = scmp.lt.s32.totalorder %s741_s14, 2 }
  0x13   : > { %s136_s25 = sand.u32 1, %s729_s11   ;;  %s516_s27 = sshll.u32 %s737_s13, 3 }
  0x14   : > { %s500_s26 = sshll.u32 %s136_s25, 3  ;;  %s147_s30 = scalar_lea.hbm %s931_s0, %s516_s27 }
  0x15   : > { %s140_s3 = scalar_lea.vmem [#allocation2], %s500_s26  ;;  %s149_s5 = sshll.u32 %s147_s30, 4  ;;  %s150_s5 = int_to_ptr.hbm [resolvable:$true] %s149_s5 }
  0x16   : > { %s151_s4 = sshll.u32 %s140_s3, 4  ;;  %p526_p0 = pnand %p536_p13, %p800_p4  ;;  %s152_s4 = int_to_ptr.vmem [resolvable:$true] %s151_s4 }
  0x17   : > { %p503_p1 = scmp.ge.s32.totalorder %s741_s14, 1  ;;  %p156_p2 = scmp.lt.s32.totalorder %s741_s14, 3 }
  0x18   : > { %s137_s6 = scalar_lea.sflag [#allocation3], %s136_s25 }
  0x19   : > { %528 = dma.hbm_to_vmem [thread:$0]  (!%p526_p0), %s150_s5, 128, %s152_s4, %s137_s6  }
  0x1a   : > { %p157_p3 = pnand %p503_p1, %p156_p2 }
  0x1b   : > { %s833_s7 = sand.u32 (!%p157_p3), 1, %s725_s10  }
  0x1c   : > { %160 = sbr.rel (%p157_p3) target bundleno = 138 (0x8a), region = 24  ;;  %s504_s8 = sshll.u32 (!%p157_p3), %s833_s7, 3 }
  0x1d   : > { %s163_s15 = scalar_lea.sflag (!%p157_p3), [#allocation3], %s833_s7  ;;  %s166_s16 = scalar_lea.vmem (!%p157_p3), [#allocation2], %s504_s8 }
  0x21   : > { %708 = dma.done.wait (%p806_p8), %s163_s15, 128  }
  0x22   : > { %710 = vsyncadd (%p806_p8), %s163_s15, 4294967168  ;;  %v743_v0 = vmov 4.0   ;;  %v196_v2 = vld [vmem:[%s166_s16] sm:$0xff]  ;;  %vm203_vm0 = vcmask 1043456   ;;  %v323_v24 = vlaneseq  ;;  %s506_s18 = sshll.u32 %s833_s7, 2  ;;  %vm320_vm2 = vcmask 1040384  }
  0x23   : > { %587 = vrcp.f32 %v743_v0  ;;  %198 = vst [vmem:[#allocation1] ss:$2 sm:$0xff] %v196_v2  ;;  %s854_s19 = scalar_lea.vmem [#allocation6], %s506_s18  ;;  %s518_s20 = sshll.u32 %s733_s12, 2 }
  0x24   : > { %vm846_vm3 = vcmp.lt.s32.totalorder %v323_v24, 256  ;;  %s371_s26 = scalar_lea.hbm %s933_s2, %s518_s20  ;;  %s373_s27 = sshll.u32 %s854_s19, 4  ;;  %s374_s27 = int_to_ptr.vmem [resolvable:$true] %s373_s27 }
  0x25   : > { %s375_s28 = sshll.u32 %s371_s26, 4  ;;  %s341_s29 = scalar_lea.sflag [#allocation7], %s833_s7  ;;  %s376_s28 = int_to_ptr.hbm [resolvable:$true] %s375_s28 }
  0x26   : > { %s641_s30 = sshra.s32 %s376_s28, 4  ;;  %s647_s6 = scalar_lea.hbm %s933_s2, 8  ;;  %s642_s30 = int_to_ptr.hbm [resolvable:$true] %s641_s30 }
  0x27   : > { %s643_s3 = scalar_lea.hbm %s642_s30, 4  ;;  %p648_p7 = scmp.lt.s32.totalorder %s642_s30, %s933_s2 }
  0x28   : > { %p644_p4 = scmp.ne.s32.totalorder %s642_s30, %s643_s3  ;;  %p649_p8 = scmp.lt.s32.totalorder %s647_s6, %s643_s3 }
  0x29   : > { %v588_v1 = vpop.eup %587 }
  0x2a   : > { %v219_v3 = vmul.f32 4.0, %v588_v1  ;;  %v199_v5 = vld.sshfl [vmem:[#allocation1] sm:$0xff pattern:$0x75316420]  ;;  %vm223_vm1 = vweird.f32 %v588_v1  ;;  %p645_p5 = pnand %p644_p4, %p810_p9  ;;  %p650_p10 = por %p649_p8, %p648_p7 }
  0x2b   : > { %v200_v6 = vld.sshfl [vmem:[#allocation1 + $0x8] sm:$0xff pattern:$0x75316420]  ;;  %v204_v7 = vsel %vm203_vm0, %v199_v5, 0.0 }
  0x2c   : > { %v220_v4 = vsub.f32 1.0, %v219_v3  ;;  %v211_v8 = vsel %vm203_vm0, %v200_v6, 0.0  ;;  %v205_v9 = vrot.slane %v204_v7, 4  ;;  %p646_p6 = pneg %p645_p5 }
  0x2d   : > { %v212_v10 = vrot.slane %v211_v8, 4 }
  0x2e   : > { %v221_v11 = vmul.f32 %v588_v1, %v220_v4  ;;  %v206_v12 = vadd.f32 %v205_v9, %v204_v7  ;;  %p651_p13 = pnand %p650_p10, %p646_p6 }
  0x2f   : > { %v213_v13 = vadd.f32 %v212_v10, %v211_v8 }
  0x30   : > { %v207_v14 = vrot.slane %v206_v12, 2  ;;  %v222_v16 = vadd.f32 %v588_v1, %v221_v11 }
  0x31   : > { %v214_v15 = vrot.slane %v213_v13, 2 }
  0x32   : > { %v208_v17 = vadd.f32 %v207_v14, %v206_v12  ;;  %v224_v21 = vsel %vm223_vm1, %v588_v1, %v222_v16 }
  0x33   : > { %v215_v18 = vadd.f32 %v214_v15, %v213_v13 }
  0x34   : > { %v209_v19 = vrot.slane %v208_v17, 1 }
  0x35   : > { %v216_v20 = vrot.slane %v215_v18, 1 }
  0x36   : > { %v210_v22 = vadd.f32 %v209_v19, %v208_v17 }
  0x37   : > { %v217_v23 = vadd.f32 %v216_v20, %v215_v18 }
  0x38   : > { %v225_v26 = vmul.f32 %v224_v21, %v210_v22 }
  0x39   : > { %v226_v25 = vmul.f32 %v224_v21, %v217_v23 }
  0x3b   : > { %v229_v27 = vrot.slane %v226_v25, 4  ;;  %v319_v28 = vrot.slane %v226_v25, 7 }
  0x3d   : > { %v230_v30 = vsel %vm203_vm0, %v225_v26, %v229_v27  ;;  %v321_v31 = vsel %vm320_vm2, %v225_v26, %v319_v28 }
  0x3e   : > { %v852_v32 = vsub.f32 %v196_v2, %v230_v30  ;;  %327 = vst.msk [vmem:[%s854_s19] ss:$2 sm:$0x3] %vm846_vm3, %v321_v31 }
  0x40   : > { %v233_v33 = vmul.f32 %v852_v32, %v852_v32 }
  0x42   : > { %235 = vst [vmem:[#allocation1] ss:$2 sm:$0xff] %v233_v33 }
  0x49   : > { %v236_v34 = vld.sshfl [vmem:[#allocation1] sm:$0xff pattern:$0x75316420]  ;;  %v237_v35 = vld.sshfl [vmem:[#allocation1 + $0x8] sm:$0xff pattern:$0x75316420] }
  0x4a   : > { %v240_v36 = vsel %vm203_vm0, %v236_v34, 0.0  ;;  %v247_v37 = vsel %vm203_vm0, %v237_v35, 0.0 }
  0x4b   : > { %v241_v38 = vrot.slane %v240_v36, 4  ;;  %v248_v39 = vrot.slane %v247_v37, 4 }
  0x4d   : > { %v242_v40 = vadd.f32 %v241_v38, %v240_v36  ;;  %v249_v41 = vadd.f32 %v248_v39, %v247_v37 }
  0x4f   : > { %v243_v42 = vrot.slane %v242_v40, 2  ;;  %v250_v43 = vrot.slane %v249_v41, 2 }
  0x51   : > { %v251_v44 = vadd.f32 %v250_v43, %v249_v41  ;;  %v244_v45 = vadd.f32 %v243_v42, %v242_v40 }
  0x53   : > { %v252_v46 = vrot.slane %v251_v44, 1  ;;  %v245_v47 = vrot.slane %v244_v45, 1 }
  0x55   : > { %v246_v48 = vadd.f32 %v245_v47, %v244_v45  ;;  %v253_v49 = vadd.f32 %v252_v46, %v251_v44 }
  0x57   : > { %v254_v50 = vmul.f32 0.33333334, %v246_v48  ;;  %v255_v51 = vmul.f32 0.33333334, %v253_v49 }
  0x59   : > { %589 = vrsqrt.f32 %v254_v50  ;;  %vm263_vm4 = vcmp.eq.f32.partialorder %v254_v50, inf  ;;  %v266_v1 = vand.u32 2147483648, %v254_v50  ;;  %vm265_vm5 = vcmp.eq.f32.partialorder %v254_v50, 0.0 }
  0x5a   : > { %591 = vrsqrt.f32 %v255_v51  ;;  %vm275_vm6 = vcmp.eq.f32.partialorder %v255_v51, inf  ;;  %v278_v4 = vand.u32 2147483648, %v255_v51  ;;  %vm277_vm7 = vcmp.eq.f32.partialorder %v255_v51, 0.0 }
  0x5f   : > { %v590_v52 = vpop.eup %589 }
  0x60   : > { %v592_v53 = vpop.eup %591  ;;  %v257_v54 = vmul.f32 %v590_v52, %v254_v50 }
  0x61   : > { %v269_v55 = vmul.f32 %v592_v53, %v255_v51 }
  0x62   : > { %v258_v56 = vmul.f32 %v590_v52, %v257_v54 }
  0x63   : > { %v270_v57 = vmul.f32 %v592_v53, %v269_v55 }
  0x64   : > { %v259_v58 = vmul.f32 0.5, %v258_v56 }
  0x65   : > { %v271_v59 = vmul.f32 0.5, %v270_v57 }
  0x66   : > { %v260_v60 = vsub.f32 1.5, %v259_v58 }
  0x67   : > { %v272_v61 = vsub.f32 1.5, %v271_v59 }
  0x68   : > { %v261_v62 = vmul.f32 %v590_v52, %v260_v60 }
  0x69   : > { %v273_v63 = vmul.f32 %v592_v53, %v272_v61 }
  0x6a   : > { %v262_v0 = vmul.f32 %v261_v62, %v254_v50 }
  0x6b   : > { %v274_v2 = vmul.f32 %v273_v63, %v255_v51 }
  0x6c   : > { %v264_v3 = vsel %vm263_vm4, %v254_v50, %v262_v0 }
  0x6d   : > { %v267_v5 = vsel %vm265_vm5, %v266_v1, %v264_v3  ;;  %v276_v6 = vsel %vm275_vm6, %v255_v51, %v274_v2 }
  0x6e   : > { %v279_v7 = vsel %vm277_vm7, %v278_v4, %v276_v6  ;;  %v280_v8 = vadd.f32 1e-05, %v267_v5 }
  0x6f   : > { %v281_v9 = vadd.f32 1e-05, %v279_v7  ;;  %v330_v10 = vrot.slane %v279_v7, 7 }
  0x70   : > { %593 = vrcp.f32 %v280_v8 }
  0x71   : > { %595 = vrcp.f32 %v281_v9  ;;  %v331_v11 = vsel %vm320_vm2, %v267_v5, %v330_v10 }
  0x72   : > { %507 = vst.msk [vmem:[%s854_s19 + $0x1] ss:$2 sm:$0x3] %vm846_vm3, %v331_v11 }
  0x73   : > { %654 = shalt.err (!%p651_p13)
}
  0x74   : > { %522 = dma.vmem_to_hbm [thread:$0]  (%p810_p9), %s374_s27, 64, %s376_s28, %s341_s29   ;;  %v308_v19 = vand.u32 2147483648, %v281_v9  ;;  %v306_v21 = vand.u32 2147483647, %v281_v9  ;;  %vm287_vm10 = vweird.f32 %v280_v8  ;;  %v293_v23 = vand.u32 2147483648, %v280_v8 }
  0x75   : > { %s517_s18 = sshll.u32 %s733_s12, 3  ;;  %v291_v25 = vand.u32 2147483647, %v280_v8  ;;  %vm302_vm12 = vweird.f32 %v281_v9  ;;  %s185_s12 = scalar_lea.vmem [#allocation5], %s504_s8 }
  0x76   : > { %v594_v12 = vpop.eup %593  ;;  %v309_v27 = vor.u32 1.1754944e-38, %v308_v19  ;;  %s354_s21 = scalar_lea.hbm %s932_s1, %s517_s18  ;;  %vm307_vm14 = vcmp.eq.f32.partialorder %v306_v21, 8.507059e+37  ;;  %v294_v30 = vor.u32 1.1754944e-38, %v293_v23  ;;  %s356_s25 = sshll.u32 %s185_s12, 4  ;;  %s357_s25 = int_to_ptr.vmem [resolvable:$true] %s356_s25 }
  0x77   : > { %v596_v13 = vpop.eup %595  ;;  %v283_v14 = vmul.f32 %v594_v12, %v280_v8  ;;  %vm288_vm8 = vweird.f32 %v594_v12  ;;  %vm292_vm15 = vcmp.eq.f32.partialorder %v291_v25, 8.507059e+37  ;;  %s358_s26 = sshll.u32 %s354_s21, 4  ;;  %s336_s27 = scalar_lea.sflag [#allocation4], %s833_s7  ;;  %s359_s26 = int_to_ptr.hbm [resolvable:$true] %s358_s26 }
  0x78   : > { %v298_v15 = vmul.f32 %v596_v13, %v281_v9  ;;  %vm303_vm9 = vweird.f32 %v596_v13  ;;  %vm884_vm11 = vmor %vm287_vm10, %vm288_vm8  ;;  %s669_s28 = sshra.s32 %s359_s26, 4  ;;  %s675_s3 = scalar_lea.hbm %s932_s1, 16  ;;  %s670_s28 = int_to_ptr.hbm [resolvable:$true] %s669_s28 }
  0x79   : > { %v284_v16 = vsub.f32 1.0, %v283_v14  ;;  %vm304_vm13 = vmor %vm302_vm12, %vm303_vm9  ;;  %s671_s29 = scalar_lea.hbm %s670_s28, 8  ;;  %p676_p3 = scmp.lt.s32.totalorder %s670_s28, %s932_s1 }
  0x7a   : > { %v299_v17 = vsub.f32 1.0, %v298_v15  ;;  %p672_p0 = scmp.ne.s32.totalorder %s670_s28, %s671_s29  ;;  %p677_p4 = scmp.lt.s32.totalorder %s675_s3, %s671_s29 }
  0x7b   : > { %v285_v18 = vmul.f32 %v594_v12, %v284_v16 }
  0x7c   : > { %v300_v20 = vmul.f32 %v596_v13, %v299_v17  ;;  %p673_p1 = pnand %p672_p0, %p810_p9  ;;  %p678_p5 = por %p677_p4, %p676_p3 }
  0x7d   : > { %v286_v22 = vadd.f32 %v594_v12, %v285_v18 }
  0x7e   : > { %v301_v26 = vadd.f32 %v596_v13, %v300_v20  ;;  %p674_p2 = pneg %p673_p1 }
  0x7f   : > { %v290_v28 = vsel %vm884_vm11, %v594_v12, %v286_v22 }
  0x80   : > { %v305_v29 = vsel %vm304_vm13, %v596_v13, %v301_v26  ;;  %v295_v34 = vsel %vm292_vm15, %v294_v30, %v290_v28  ;;  %p679_p6 = pnand %p678_p5, %p674_p2 }
  0x81   : > { %v310_v31 = vsel %vm307_vm14, %v309_v27, %v305_v29 }
  0x82   : > { %v314_v33 = vrot.slane %v310_v31, 4 }
  0x84   : > { %v315_v35 = vsel %vm203_vm0, %v295_v34, %v314_v33 }
  0x85   : > { %v317_v36 = vmul.f32 %v315_v35, %v852_v32 }
  0x87   : > { %318 = vst [vmem:[%s185_s12] sm:$0xff] %v317_v36 }
  0x88   : > { %682 = shalt.err (!%p679_p6)
}
  0x89   : > { %521 = dma.vmem_to_hbm [thread:$0]  (%p810_p9), %s357_s25, 128, %s359_s26, %s336_s27  }
  0x8a PF: > { %s387_s7 = sand.u32 1, %s721_s9   ;;  %p530_p7 = pnand %p499_p12, %p817_p11 }
  0x8b   : > { %s388_s6 = scalar_lea.sflag [#allocation4], %s387_s7 }
  0x8c   : > { %p531_p8 = pneg %p530_p7 }
  0x8e   : > { %712 = dma.done.wait (%p531_p8), %s388_s6, 128  }
  0x8f   : > { %714 = vsyncadd (%p531_p8), %s388_s6, 4294967168  ;;  %s398_s15 = scalar_lea.sflag [#allocation7], %s387_s7 }
  0x90   : > { %716 = dma.done.wait (%p531_p8), %s398_s15, 64  }
  0x91   : > { %718 = vsyncadd (%p531_p8), %s398_s15, 4294967232  ;;  %s22_s14 = sadd.s32 1, %s741_s14   ;;  %s942_s9 = smov %s725_s10 }
  0x92   : > { %p19_p10 = scmp.ge.s32.totalorder %s22_s14, 4   ;;  %s943_s10 = smov %s729_s11 }
  0x93   : > { %s944_s11 = smov %s815_s23  ;;  %s945_s12 = smov %s737_s13 }
  0x94   : > { %s946_s13 = smov %s948_s17  ;;  %21 = sbr.rel (!%p19_p10) target bundleno = 8 (0x8), region = 87 }
  0x99   :  { %404 = vsyncpa [#allocation3], 1 }
  0x9a   :  { %406 = vsyncpa [#allocation3 + $0x1], 1 }
  0x9b   :  { %407 = vsyncpa [#allocation4], 1 }
  0x9c   :  { %409 = vsyncpa [#allocation4 + $0x1], 1 }
  0x9d   :  { %410 = vsyncpa [#allocation7], 1 }
  0x9e   :  { %412 = vsyncpa [#allocation7 + $0x1], 1 }

</bundles_post_ra>
